<compile_context>
chip_gen: v5e
topology: v5e:2x2
jax: 0.10.0
libtpu: 0.0.40
codegen_flags: <defaults>
</compile_context>

<pallas_src>
import functools

import jax
import jax.numpy as jnp
from jax.experimental import pallas as pl
from jax.experimental.pallas import tpu as pltpu


# ----------------------------------------------------------------------------
# Plain-JAX grouping helpers (ports of the PyTorch reference functions)
# ----------------------------------------------------------------------------

def square_distance(src, dst):
    return jnp.sum((src[:, :, None, :] - dst[:, None, :, :]) ** 2, axis=-1)


def farthest_point_sample(xyz, npoint):
    B, N, C = xyz.shape

    def body(i, carry):
        centroids, distance, farthest = carry
        centroids = centroids.at[:, i].set(farthest)
        idx = jnp.broadcast_to(farthest[:, None, None], (B, 1, C))
        centroid = jnp.take_along_axis(xyz, idx, axis=1)          # (B,1,C)
        dist = jnp.sum((xyz - centroid) ** 2, axis=-1)            # (B,N)
        distance = jnp.minimum(distance, dist)
        farthest = jnp.argmax(distance, axis=-1).astype(jnp.int32)
        return centroids, distance, farthest

    centroids = jnp.zeros((B, npoint), jnp.int32)
    distance = jnp.full((B, N), 1e10, jnp.float32)
    farthest = jnp.zeros((B,), jnp.int32)   # deterministic start (see TODO above)
    centroids, _, _ = jax.lax.fori_loop(0, npoint, body,
                                        (centroids, distance, farthest))
    return centroids


def index_points(points, idx):
    B = points.shape[0]
    C = points.shape[-1]
    raw_shape = idx.shape
    idx_flat = idx.reshape(B, -1)
    idx_exp = jnp.broadcast_to(idx_flat[..., None], (B, idx_flat.shape[1], C))
    out = jnp.take_along_axis(points, idx_exp, axis=1)
    return out.reshape(*raw_shape, C)


def query_ball_point(radius, nsample, xyz, new_xyz):
    B, N, _ = xyz.shape
    S = new_xyz.shape[1]
    sqrdists = square_distance(new_xyz, xyz)                      # (B,S,N)
    group_idx = jnp.broadcast_to(jnp.arange(N, dtype=jnp.int32), (B, S, N))
    group_idx = jnp.where(sqrdists > radius ** 2, N, group_idx)
    group_idx = jnp.sort(group_idx, axis=-1)[:, :, :nsample]
    group_first = jnp.broadcast_to(group_idx[:, :, :1], (B, S, nsample))
    group_idx = jnp.where(group_idx == N, group_first, group_idx)
    return group_idx


def sample_and_group(npoint, radius, nsample, xyz, points, knn=False):
    fps_idx = farthest_point_sample(xyz, npoint)                  # (B,S)
    new_xyz = index_points(xyz, fps_idx)                          # (B,S,3)
    if knn:
        dists = square_distance(new_xyz, xyz)
        idx = jnp.argsort(dists, axis=-1)[:, :, :nsample].astype(jnp.int32)
    else:
        idx = query_ball_point(radius, nsample, xyz, new_xyz)
    grouped_xyz = index_points(xyz, idx)                          # (B,S,K,3)
    grouped_xyz_norm = grouped_xyz - new_xyz[:, :, None, :]
    if points is not None:
        grouped_points = index_points(points, idx)                # (B,S,K,D)
        new_points = jnp.concatenate([grouped_xyz_norm, grouped_points], axis=-1)
    else:
        new_points = grouped_xyz_norm
    return new_xyz, new_points


def sample_and_group_all(xyz, points):
    B, N, C = xyz.shape
    new_xyz = jnp.zeros((B, 1, C), xyz.dtype)
    grouped_xyz = xyz.reshape(B, 1, N, C)
    if points is not None:
        new_points = jnp.concatenate(
            [grouped_xyz, points.reshape(B, 1, N, -1)], axis=-1)
    else:
        new_points = grouped_xyz
    return new_xyz, new_points


# ----------------------------------------------------------------------------
# One-time parameter preparation (BN fold + pad + bf16 cast, hoisted out of fwd)
# ----------------------------------------------------------------------------

def _round_up(x, m):
    return ((x + m - 1) // m) * m


def _fold_bn(layer, eps=1e-5):
    """Fold eval-mode BatchNorm into the 1x1-conv weight/bias. w is [in,out]."""
    scale = layer["gamma"] / jnp.sqrt(layer["var"] + eps)
    w = layer["w"] * scale[None, :]
    b = (layer["b"] - layer["mean"]) * scale + layer["beta"]
    return w, b


def prepare_mlp_params(params, eps=1e-5):
    """Fold BN, pad output channel dims to multiples of 128, cast weights bf16.

    Input channel dim (first layer) is kept at its TRUE width — no 128 padding
    of the activation stream; only the padded output channels of layer l feed
    zero rows into layer l+1's weight, so results are unchanged.
    """
    folded = [_fold_bn(p, eps) for p in params]
    c_in = folded[0][0].shape[0]
    dims = [c_in] + [w.shape[1] for w, _ in folded]
    dims_pad = [c_in] + [_round_up(d, 128) for d in dims[1:]]
    ws, bs = [], []
    for (w, b), cin_p, cout_p in zip(folded, dims_pad[:-1], dims_pad[1:]):
        wp = jnp.pad(w.astype(jnp.float32),
                     ((0, cin_p - w.shape[0]),
                      (0, cout_p - w.shape[1]))).astype(jnp.bfloat16)
        bp = jnp.pad(b.astype(jnp.float32),
                     (0, cout_p - b.shape[0])).reshape(1, cout_p)
        ws.append(wp)
        bs.append(bp)
    return {
        "ws": tuple(ws),
        "bs": tuple(bs),
        "dims": tuple(dims),
        "dims_pad": tuple(dims_pad),
        "out_channels": dims[-1],
    }


# ----------------------------------------------------------------------------
# Pallas kernel: fused (Conv1x1 + BN(eval) + ReLU)* + running max over nsample
# ----------------------------------------------------------------------------

def _mlp_max_kernel(x_ref, *refs, n_layers, t_rows, k_tile, c_out_pad):
    out_ref = refs[-2]          # (T, C_out_pad) output block (resident over k)
    acc_ref = refs[-1]          # (T, C_out_pad) f32 running-max scratch
    wb = refs[:-2]              # w0,b0,w1,b1,...

    @pl.when(pl.program_id(1) == 0)
    def _():
        # ReLU outputs are >= 0, so 0 is a valid identity for the running max.
        acc_ref[...] = jnp.zeros_like(acc_ref)

    c_in = x_ref.shape[-1]
    # Fat-M: one matmul over all T*k_tile grouped points in this block (bf16).
    h = x_ref[...].reshape(t_rows * k_tile, c_in)
    for l in range(n_layers):
        w = wb[2 * l][...]                                   # bf16
        b = wb[2 * l + 1][...]                               # f32
        h = jnp.dot(h, w, preferred_element_type=jnp.float32) + b
        h = jnp.maximum(h, 0.0)                              # f32 epilogue
        if l + 1 < n_layers:
            h = h.astype(jnp.bfloat16)                       # bf16 between layers
    h = h.reshape(t_rows, k_tile, c_out_pad)
    acc_ref[...] = jnp.maximum(acc_ref[...], jnp.max(h, axis=1))

    @pl.when(pl.program_id(1) == pl.num_programs(1) - 1)
    def _():
        out_ref[...] = acc_ref[...].astype(out_ref.dtype)


def mlp_maxpool_pallas(grouped, prepared, *, tile_rows=256, max_k_tile=64,
                       out_dtype=jnp.float32):
    """grouped: (B, S, K, C_in) -> (B, S, mlp[-1]) via fused MLP + max over K."""
    ws, bs = prepared["ws"], prepared["bs"]
    dims_pad = prepared["dims_pad"]
    out_channels = prepared["out_channels"]
    c_out_pad = dims_pad[-1]
    n_layers = len(ws)

    B, S, K, C_in = grouped.shape
    assert C_in == prepared["dims"][0], "channel mismatch with prepared params"
    M = B * S

    # --- K (nsample) tiling: KT always a multiple of 8 -----------------------
    max_k_tile = max(8, _round_up(max_k_tile, 8))
    K8 = _round_up(K, 8)
    KT = K8 if K8 <= max_k_tile else max_k_tile
    K_pad = _round_up(K, KT)

    # --- cap the live f32 intermediate (~8 MiB) ------------------------------
    max_cpad = max(dims_pad[1:])
    while tile_rows > 8 and tile_rows * KT * max_cpad * 4 > (8 << 20):
        tile_rows //= 2
    tile_rows = max(8, _round_up(tile_rows, 8))

    # --- M (B*npoint) tiling --------------------------------------------------
    if M <= tile_rows:
        if M >= 16:
            T = _round_up(-(-M // 2), 8)   # >=2 grid steps for dual-TC chips
        else:
            T = M                          # block == full dim is always legal
    else:
        T = tile_rows
    M_pad = _round_up(M, T)

    # --- prepare activations in bf16 at their TRUE channel width -------------
    x = grouped.astype(jnp.bfloat16).reshape(M, K, C_in)
    if K_pad != K:
        # Pad the nsample axis by repeating the first group element: max is
        # unaffected and no masking is needed in-kernel.
        pad = jnp.broadcast_to(x[:, :1, :], (M, K_pad - K, C_in))
        x = jnp.concatenate([x, pad], axis=1)
    if M_pad != M:
        x = jnp.pad(x, ((0, M_pad - M), (0, 0), (0, 0)))

    # --- explicit VMEM budget with headroom ----------------------------------
    wb_bytes = sum(int(w.size) * 2 + int(b.size) * 4 for w, b in zip(ws, bs))
    est = (2 * T * KT * C_in * 2            # x block, double-buffered bf16
           + 2 * wb_bytes                   # weight/bias blocks, double-buffered
           + 2 * T * c_out_pad * 4          # output block, double-buffered
           + T * c_out_pad * 4              # running-max scratch
           + 2 * T * KT * max_cpad * 4)     # live intermediates headroom
    vmem_limit = int(min(max(2 * est, 32 << 20), 100 << 20))

    kernel = functools.partial(_mlp_max_kernel, n_layers=n_layers,
                               t_rows=T, k_tile=KT, c_out_pad=c_out_pad)

    in_specs = [pl.BlockSpec((T, KT, C_in), lambda i, k: (i, k, 0))]
    flat_wb = []
    for w, b in zip(ws, bs):
        in_specs.append(pl.BlockSpec(w.shape, lambda i, k: (0, 0)))
        in_specs.append(pl.BlockSpec(b.shape, lambda i, k: (0, 0)))
        flat_wb += [w, b]

    out = pl.pallas_call(
        kernel,
        out_shape=jax.ShapeDtypeStruct((M_pad, c_out_pad), out_dtype),
        grid_spec=pltpu.PrefetchScalarGridSpec(
            num_scalar_prefetch=0,
            grid=(M_pad // T, K_pad // KT),
            in_specs=in_specs,
            out_specs=pl.BlockSpec((T, c_out_pad), lambda i, k: (i, 0)),
            scratch_shapes=[pltpu.VMEM((T, c_out_pad), jnp.float32)],
        ),
        compiler_params=pltpu.CompilerParams(
            dimension_semantics=("parallel", "arbitrary"),
            vmem_limit_bytes=vmem_limit),
    )(x, *flat_wb)

    res = out
    if M_pad != M:
        res = res[:M]
    if c_out_pad != out_channels:
        res = res[:, :out_channels]
    return res.reshape(B, S, out_channels)


# ----------------------------------------------------------------------------
# Module-level wrapper (PointNetSetAbstraction.forward)
# ----------------------------------------------------------------------------

def pointnet_set_abstraction(xyz, points, prepared, *, npoint, radius, nsample,
                             group_all, knn=False, tile_rows=256):
    if group_all:
        new_xyz, new_points = sample_and_group_all(xyz, points)
    else:
        new_xyz, new_points = sample_and_group(npoint, radius, nsample,
                                               xyz, points, knn=knn)
    feats = mlp_maxpool_pallas(new_points, prepared, tile_rows=tile_rows)
    return new_xyz, feats


def reference_forward(xyz, points, params, *, npoint, radius, nsample,
                      group_all, knn=False):
    if group_all:
        new_xyz, new_points = sample_and_group_all(xyz, points)
    else:
        new_xyz, new_points = sample_and_group(npoint, radius, nsample,
                                               xyz, points, knn=knn)
    h = new_points
    for p in params:
        w, b = _fold_bn(p)
        h = jax.nn.relu(h @ w + b)
    return new_xyz, jnp.max(h, axis=2)


def init_params(key, in_channel, mlp):
    params = []
    last = in_channel
    for i, out in enumerate(mlp):
        k = jax.random.fold_in(key, i)
        kw, kb, kg, kbe, km, kv = jax.random.split(k, 6)
        params.append({
            "w": jax.random.normal(kw, (last, out), jnp.float32) / jnp.sqrt(last),
            "b": jax.random.normal(kb, (out,), jnp.float32) * 0.01,
            "gamma": 1.0 + 0.1 * jax.random.normal(kg, (out,), jnp.float32),
            "beta": 0.1 * jax.random.normal(kbe, (out,), jnp.float32),
            "mean": 0.05 * jax.random.normal(km, (out,), jnp.float32),
            "var": jnp.abs(1.0 + 0.1 * jax.random.normal(kv, (out,), jnp.float32)),
        })
        last = out
    return params


if __name__ == "__main__":
    key = jax.random.PRNGKey(0)
    k_xyz, k_pts, k_par = jax.random.split(key, 3)

    B, N, D = 2, 64, 3
    npoint, radius, nsample = 16, 0.5, 8
    mlp = (32, 64)

    xyz = jax.random.normal(k_xyz, (B, N, 3), jnp.float32)
    points = jax.random.normal(k_pts, (B, N, D), jnp.float32)
    params = init_params(k_par, in_channel=3 + D, mlp=mlp)
    prepared = prepare_mlp_params(params)   # BN fold + pad + bf16 cast, once

    # --- grouped (FPS + ball query) path -------------------------------------
    new_xyz, feats = pointnet_set_abstraction(
        xyz, points, prepared, npoint=npoint, radius=radius, nsample=nsample,
        group_all=False)
    jax.block_until_ready((new_xyz, feats))

    ref_xyz, ref_feats = reference_forward(
        xyz, points, params, npoint=npoint, radius=radius, nsample=nsample,
        group_all=False)
    assert new_xyz.shape == (B, npoint, 3)
    assert feats.shape == (B, npoint, mlp[-1])
    assert jnp.allclose(new_xyz, ref_xyz, atol=1e-5, rtol=1e-5)
    # bf16 data path -> loosened tolerance (expected precision loss, not a bug)
    assert jnp.allclose(feats, ref_feats, atol=3e-2, rtol=3e-2)

    # --- group_all path -------------------------------------------------------
    new_xyz2, feats2 = pointnet_set_abstraction(
        xyz, points, prepared, npoint=None, radius=None, nsample=None,
        group_all=True)
    jax.block_until_ready((new_xyz2, feats2))

    ref_xyz2, ref_feats2 = reference_forward(
        xyz, points, params, npoint=None, radius=None, nsample=None,
        group_all=True)
    assert new_xyz2.shape == (B, 1, 3)
    assert feats2.shape == (B, 1, mlp[-1])
    assert jnp.allclose(feats2, ref_feats2, atol=3e-2, rtol=3e-2)

    print("KERNEL_OK")
</pallas_src>

<mosaic_0001>
module attributes {stable_mosaic.version = 11 : i64} {
  func.func @_mlp_max_kernel(%arg0: i32, %arg1: i32, %arg2: memref<16x8x6xbf16, #tpu.memory_space<vmem>>, %arg3: memref<6x128xbf16, #tpu.memory_space<vmem>>, %arg4: memref<1x128xf32, #tpu.memory_space<vmem>>, %arg5: memref<128x128xbf16, #tpu.memory_space<vmem>>, %arg6: memref<1x128xf32, #tpu.memory_space<vmem>>, %arg7: memref<16x128xf32, #tpu.memory_space<vmem>>, %arg8: memref<16x128xf32, #tpu.memory_space<vmem>>) attributes {dimension_semantics = [#tpu.dimension_semantics<parallel>, #tpu.dimension_semantics<arbitrary>], iteration_bounds = array<i64: 2, 1>, scalar_prefetch = 0 : i64, scratch_operands = 1 : i64, tpu.core_type = #tpu.core_type<tc>, window_params = [{transform_indices = @transform_0, window_bounds = array<i64: 16, 8, 6>}, {pipeline_mode = #tpu.pipeline_mode<synchronous>, transform_indices = @transform_1, window_bounds = array<i64: 6, 128>}, {pipeline_mode = #tpu.pipeline_mode<synchronous>, transform_indices = @transform_2, window_bounds = array<i64: 1, 128>}, {pipeline_mode = #tpu.pipeline_mode<synchronous>, transform_indices = @transform_3, window_bounds = array<i64: 128, 128>}, {pipeline_mode = #tpu.pipeline_mode<synchronous>, transform_indices = @transform_4, window_bounds = array<i64: 1, 128>}, {transform_indices = @transform_5, window_bounds = array<i64: 16, 128>}]} {
    %c0_i32 = arith.constant 0 : i32
    %0 = arith.cmpi eq, %arg1, %c0_i32 : i32
    %1 = arith.extui %0 : i1 to i32
    %c0_i32_0 = arith.constant 0 : i32
    %2 = arith.cmpi ne, %1, %c0_i32_0 : i32
    scf.if %2 {
      %cst_21 = arith.constant 0.000000e+00 : f32
      %28 = vector.broadcast %cst_21 : f32 to vector<16x128xf32>
      %c0_22 = arith.constant 0 : index
      %c0_23 = arith.constant 0 : index
      %29 = vector.load %arg8[%c0_22, %c0_23] : memref<16x128xf32, #tpu.memory_space<vmem>>, vector<16x128xf32>
      tpu.vector_store %arg8[%c0_22, %c0_23], %28 {strides = array<i32>} : memref<16x128xf32, #tpu.memory_space<vmem>>, vector<16x128xf32>,
    } else {
    }
    %c0 = arith.constant 0 : index
    %c0_1 = arith.constant 0 : index
    %c0_2 = arith.constant 0 : index
    %3 = vector.load %arg2[%c0, %c0_1, %c0_2] : memref<16x8x6xbf16, #tpu.memory_space<vmem>>, vector<16x8x6xbf16>
    %4 = vector.shape_cast %3 : vector<16x8x6xbf16> to vector<128x6xbf16>
    %c0_3 = arith.constant 0 : index
    %c0_4 = arith.constant 0 : index
    %5 = vector.load %arg3[%c0_3, %c0_4] : memref<6x128xbf16, #tpu.memory_space<vmem>>, vector<6x128xbf16>
    %c0_5 = arith.constant 0 : index
    %c0_6 = arith.constant 0 : index
    %6 = vector.load %arg4[%c0_5, %c0_6] : memref<1x128xf32, #tpu.memory_space<vmem>>, vector<1x128xf32>
    %cst = arith.constant dense<0.000000e+00> : vector<128x128xf32>
    %7 = tpu.matmul %4, %5, %cst {dimension_numbers = #tpu.dot_dimension_numbers<[1], [0], [0], [1], [0, 0, 1, 1], [], []>} : vector<128x6xbf16>, vector<6x128xbf16>, vector<128x128xf32> -> vector<128x128xf32>
    %8 = vector.broadcast %6 : vector<1x128xf32> to vector<128x128xf32>
    %9 = arith.addf %7, %8 : vector<128x128xf32>
    %cst_7 = arith.constant 0.000000e+00 : f32
    %10 = vector.broadcast %cst_7 : f32 to vector<128x128xf32>
    %11 = arith.maximumf %9, %10 : vector<128x128xf32>
    %12 = arith.truncf %11 : vector<128x128xf32> to vector<128x128xbf16>
    %c0_8 = arith.constant 0 : index
    %c0_9 = arith.constant 0 : index
    %13 = vector.load %arg5[%c0_8, %c0_9] : memref<128x128xbf16, #tpu.memory_space<vmem>>, vector<128x128xbf16>
    %c0_10 = arith.constant 0 : index
    %c0_11 = arith.constant 0 : index
    %14 = vector.load %arg6[%c0_10, %c0_11] : memref<1x128xf32, #tpu.memory_space<vmem>>, vector<1x128xf32>
    %cst_12 = arith.constant dense<0.000000e+00> : vector<128x128xf32>
    %15 = tpu.matmul %12, %13, %cst_12 {dimension_numbers = #tpu.dot_dimension_numbers<[1], [0], [0], [1], [0, 0, 1, 1], [], []>} : vector<128x128xbf16>, vector<128x128xbf16>, vector<128x128xf32> -> vector<128x128xf32>
    %16 = vector.broadcast %14 : vector<1x128xf32> to vector<128x128xf32>
    %17 = arith.addf %15, %16 : vector<128x128xf32>
    %cst_13 = arith.constant 0.000000e+00 : f32
    %18 = vector.broadcast %cst_13 : f32 to vector<128x128xf32>
    %19 = arith.maximumf %17, %18 : vector<128x128xf32>
    %20 = vector.shape_cast %19 : vector<128x128xf32> to vector<16x8x128xf32>
    %c0_14 = arith.constant 0 : index
    %c0_15 = arith.constant 0 : index
    %21 = vector.load %arg8[%c0_14, %c0_15] : memref<16x128xf32, #tpu.memory_space<vmem>>, vector<16x128xf32>
    %cst_16 = arith.constant dense<0xFF800000> : vector<16x128xf32>
    %22 = vector.multi_reduction <maximumf>, %20, %cst_16 [1] : vector<16x8x128xf32> to vector<16x128xf32>
    %23 = arith.maximumf %21, %22 : vector<16x128xf32>
    %c0_17 = arith.constant 0 : index
    %c0_18 = arith.constant 0 : index
    %24 = vector.load %arg8[%c0_17, %c0_18] : memref<16x128xf32, #tpu.memory_space<vmem>>, vector<16x128xf32>
    tpu.vector_store %arg8[%c0_17, %c0_18], %23 {strides = array<i32>} : memref<16x128xf32, #tpu.memory_space<vmem>>, vector<16x128xf32>,
    %c0_i32_19 = arith.constant 0 : i32
    %25 = arith.cmpi eq, %arg1, %c0_i32_19 : i32
    %26 = arith.extui %25 : i1 to i32
    %c0_i32_20 = arith.constant 0 : i32
    %27 = arith.cmpi ne, %26, %c0_i32_20 : i32
    scf.if %27 {
      %c0_21 = arith.constant 0 : index
      %c0_22 = arith.constant 0 : index
      %28 = vector.load %arg8[%c0_21, %c0_22] : memref<16x128xf32, #tpu.memory_space<vmem>>, vector<16x128xf32>
      %c0_23 = arith.constant 0 : index
      %c0_24 = arith.constant 0 : index
      %29 = vector.load %arg7[%c0_23, %c0_24] : memref<16x128xf32, #tpu.memory_space<vmem>>, vector<16x128xf32>
      tpu.vector_store %arg7[%c0_23, %c0_24], %28 {strides = array<i32>} : memref<16x128xf32, #tpu.memory_space<vmem>>, vector<16x128xf32>,
    } else {
    }
    return
  }
  func.func @transform_0(%arg0: i32, %arg1: i32) -> (i32, i32, i32) {
    %c0_i32 = arith.constant 0 : i32
    %c0_i32_0 = arith.constant 0 : i32
    return %arg0, %arg1, %c0_i32 : i32, i32, i32
  }
  func.func @transform_1(%arg0: i32, %arg1: i32) -> (i32, i32) {
    %c0_i32 = arith.constant 0 : i32
    %c0_i32_0 = arith.constant 0 : i32
    %c0_i32_1 = arith.constant 0 : i32
    return %c0_i32, %c0_i32_0 : i32, i32
  }
  func.func @transform_2(%arg0: i32, %arg1: i32) -> (i32, i32) {
    %c0_i32 = arith.constant 0 : i32
    %c0_i32_0 = arith.constant 0 : i32
    %c0_i32_1 = arith.constant 0 : i32
    return %c0_i32, %c0_i32_0 : i32, i32
  }
  func.func @transform_3(%arg0: i32, %arg1: i32) -> (i32, i32) {
    %c0_i32 = arith.constant 0 : i32
    %c0_i32_0 = arith.constant 0 : i32
    %c0_i32_1 = arith.constant 0 : i32
    return %c0_i32, %c0_i32_0 : i32, i32
  }
  func.func @transform_4(%arg0: i32, %arg1: i32) -> (i32, i32) {
    %c0_i32 = arith.constant 0 : i32
    %c0_i32_0 = arith.constant 0 : i32
    %c0_i32_1 = arith.constant 0 : i32
    return %c0_i32, %c0_i32_0 : i32, i32
  }
  func.func @transform_5(%arg0: i32, %arg1: i32) -> (i32, i32) {
    %c0_i32 = arith.constant 0 : i32
    %c0_i32_0 = arith.constant 0 : i32
    return %arg0, %c0_i32 : i32, i32
  }
}

</mosaic_0001>

<bundles_post_ra>
// kernel: tpu_custom_call.1
= control target key start
LH: loop header
LB: loop body
LE: loop exit
PB: predicated region body
PF: predicated region fallthrough
CT: control target
= control target key end

     0   :  { %10 = vsyncpa [#allocation4], 0  ;;  %s1253_s0 = inlined_call_operand.vmem [shape: bf16[32,8,6], index: 0, kind: input, shape index: {}]   ;;  %s1254_s1 = inlined_call_operand.vmem [shape: bf16[6,128], index: 1, kind: input, shape index: {}]   ;;  %s1255_s2 = inlined_call_operand.vmem [shape: f32[1,128], index: 2, kind: input, shape index: {}]   ;;  %s1256_s3 = inlined_call_operand.vmem [shape: bf16[128,128], index: 3, kind: input, shape index: {}]   ;;  %s1257_s4 = inlined_call_operand.vmem [shape: f32[1,128], index: 4, kind: input, shape index: {}]   ;;  %s1258_s5 = inlined_call_operand.hbm [shape: f32[32,128], index: 5, kind: output, shape index: {}]  }
   0x1   :  { %12 = vsyncpa [#allocation4 + $0x1], 0  ;;  %s1071_s18 = smov 0   ;;  %s1073_s19 = smov 0  }
   0x2   :  { %s1075_s20 = smov 0   ;;  %s1077_s21 = smov 0  }
   0x3   :  { %s1079_s22 = smov 0   ;;  %s1081_s23 = smov 0  }
   0x4 LB: > { %s789_s24 = sadd.s32 4294967295, %s1037_s23   ;;  %s790_s25 = sadd.s32 4294967294, %s1037_s23   ;;  %s1037_s23 = sphi %s1081_s23, %s18_s23   ;;  %s1033_s22 = sphi %s1079_s22, %s1265_s22   ;;  %s1029_s21 = sphi %s1077_s21, %s1264_s21   ;;  %s1025_s20 = sphi %s1075_s20, %s1263_s20   ;;  %s1021_s19 = sphi %s1073_s19, %s1262_s19   ;;  %s1017_s18 = sphi %s1071_s18, %s1261_s18  }
   0x5   : > { %s30_s26 = sadd.s32 1, %s1033_s22  ;;  %s149_s27 = sadd.s32 1, %s1025_s20 }
   0x6   : > { %p32_p0 = scmp.ge.s32.totalorder %s30_s26, 2  ;;  %p159_p1 = scmp.ne.s32.totalorder %s1025_s20, %s1021_s19 }
   0x7   : > { %p160_p2 = scmp.eq.s32.totalorder %s789_s24, 1  ;;  %p165_p3 = scmp.ne.s32.totalorder %s1021_s19, %s1017_s18 }
   0x8   : > { %s1267_s26 = smov (%p32_p0, %s30_s26), 0  ;;  %p166_p5 = scmp.eq.s32.totalorder %s790_s25, 1 }
   0x9   : > { %p1109_p4 = por %p160_p2, %p159_p1  ;;  %s146_s29 = ssub.s32 %s1033_s22, %s1267_s26 }
   0xa   : > { %p793_p6 = scmp.ge.s32.totalorder %s1037_s23, 1  ;;  %p147_p7 = scmp.eq.s32.totalorder %s146_s29, 0 }
   0xb   : > { %p1116_p8 = por %p166_p5, %p165_p3  ;;  %p208_p9 = scmp.lt.s32.totalorder %s1037_s23, 3 }
   0xc   : > { %s1122_s6 = scalar_select %p147_p7, %s1025_s20, %s149_s27  }
   0xd   : > { %p209_p10 = pnand %p793_p6, %p208_p9 }
   0xe   : > { %s1127_s9 = sshll.u32 (!%p209_p10), %s1029_s21, 4  ;;  %s236_s25 = sand.u32 (!%p209_p10), 1, %s1021_s19  }
   0xf   : > { %212 = sbr.rel (%p209_p10) target bundleno = 440 (0x1b8), region = 40  ;;  %p240_p11 = scmp.lt.s32.totalorder (!%p209_p10), %s1127_s9, 31 }
  0x10   : > { %s794_s27 = sshll.u32 (!%p209_p10), %s236_s25, 4  ;;  %s979_s17 = scalar_lea.hbm (!%p209_p10), %s1258_s5, 32 }
  0x11   : > { %s1192_s29 = scalar_lea.vmem (!%p209_p10), [#allocation3], %s794_s27 }
  0x14   : > { %v272_v0 = vld [vmem:[%s1254_s1] sm:$0x7]  ;;  %vm342_vm0 = vcmask 1042432   ;;  %s241_s10 = scalar_select %p240_p11, %s1127_s9, 31  ;;  %vm317_vm1 = vcmask 48128   ;;  %v889_v6 = vld [vmem:[%s1256_s3 + $0x38] sm:$0xff] }
  0x15   : > { %v344_v1 = vsel %vm342_vm0, %v272_v0, 0  ;;  %487 = vmatpush.bf16.msra.mxu1 %v889_v6  ;;  %v888_v7 = vld [vmem:[%s1256_s3 + $0x30] sm:$0xff]  ;;  %892 = vmatpush.bf16.msra.mxu2 %v889_v6  ;;  %v887_v8 = vld [vmem:[%s1256_s3 + $0x28] sm:$0xff]  ;;  %v886_v10 = vld [vmem:[%s1256_s3 + $0x20] sm:$0xff]  ;;  %vm666_vm2 = vcmask 1041409   ;;  %vm668_vm3 = vcmask 1042434  }
  0x16   : > { %353 = vmatpush.bf16.msra.mxu0 %v344_v1  ;;  %891 = vmatpush.bf16.msra.mxu3 %v344_v1  ;;  %s796_s11 = sshll.u32 %s241_s10, 2  ;;  %v885_v14 = vld [vmem:[%s1256_s3 + $0x18] sm:$0xff]  ;;  %v884_v15 = vld [vmem:[%s1256_s3 + $0x10] sm:$0xff]  ;;  %v883_v16 = vld [vmem:[%s1256_s3 + $0x8] sm:$0xff]  ;;  %vm670_vm4 = vcmask 1043459   ;;  %vm672_vm5 = vcmask 1044484   ;;  %s712_s10 = scalar_lea.hbm %s1258_s5, %s1127_s9 }
  0x17   : > { %s246_s14 = scalar_lea.vmem %s1253_s0, %s796_s11  ;;  %v882_v17 = vld [vmem:[%s1256_s3] sm:$0xff]  ;;  %vm674_vm6 = vcmask 1045509   ;;  %vm676_vm7 = vcmask 1046534   ;;  %vm678_vm8 = vcmask 1047559   ;;  %s713_s11 = sshll.u32 %s1192_s29, 4  ;;  %s714_s11 = int_to_ptr.vmem [resolvable:$true] %s713_s11 }
  0x18   : > { %v874_v2 = vld [vmem:[%s246_s14] sm:$0xff]  ;;  %v875_v3 = vld [vmem:[%s246_s14 + $0x8] sm:$0xff]  ;;  %v876_v4 = vld [vmem:[%s246_s14 + $0x10] sm:$0xff]  ;;  %s1212_s12 = sshll.u32 %s712_s10, 4  ;;  %s701_s9 = scalar_lea.sflag [#allocation4], %s236_s25  ;;  %s716_s12 = int_to_ptr.hbm [resolvable:$true] %s1212_s12 }
  0x19   : > { %829 = vmatmul.msk.bf16.vlgmr.msra.gmra.mxu0 %vm317_vm1, %v874_v2  ;;  %v879_v5 = vld [vmem:[%s246_s14 + $0x28] sm:$0xff]  ;;  %488 = vmatpush.bf16.msra.mxu1 %v888_v7  ;;  %v877_v9 = vld [vmem:[%s246_s14 + $0x18] sm:$0xff]  ;;  %v880_v11 = vld [vmem:[%s246_s14 + $0x30] sm:$0xff]  ;;  %s973_s13 = sshra.s32 %s716_s12, 4  ;;  %s974_s13 = int_to_ptr.hbm [resolvable:$true] %s973_s13 }
  0x1a   : > { %834 = vmatmul.msk.bf16.vlgmr.msra.gmra.mxu3 %vm317_vm1, %v879_v5  ;;  %893 = vmatpush.bf16.msra.mxu2 %v888_v7  ;;  %v878_v12 = vld [vmem:[%s246_s14 + $0x20] sm:$0xff]  ;;  %v881_v13 = vld [vmem:[%s246_s14 + $0x38] sm:$0xff]  ;;  %s975_s14 = scalar_lea.hbm %s974_s13, 16  ;;  %p980_p1 = scmp.lt.s32.totalorder %s974_s13, %s1258_s5 }
  0x1b   : > { %v957_v19 = vld [vmem:[%s1255_s2] ss:$0 sm:$0xff]  ;;  %p976_p12 = scmp.ne.s32.totalorder %s974_s13, %s975_s14  ;;  %p981_p2 = scmp.lt.s32.totalorder %s979_s17, %s975_s14 }
  0x1d   : > { %489 = vmatpush.bf16.msra.mxu1 %v887_v8  ;;  %p977_p13 = pnand %p976_p12, %p1109_p4  ;;  %p982_p3 = por %p981_p2, %p980_p1 }
  0x1e   : > { %894 = vmatpush.bf16.msra.mxu2 %v887_v8 }
  0x1f   : > { %p978_p0 = pneg %p977_p13 }
  0x21   : > { %490 = vmatpush.bf16.msra.mxu1 %v886_v10  ;;  %p983_p5 = pnand %p982_p3, %p978_p0 }
  0x22   : > { %895 = vmatpush.bf16.msra.mxu2 %v886_v10 }
  0x25   : > { %491 = vmatpush.bf16.msra.mxu1 %v885_v14 }
  0x26   : > { %896 = vmatpush.bf16.msra.mxu2 %v885_v14 }
  0x29   : > { %830 = vmatmul.msk.bf16.gmra.mxu0 %vm317_vm1, %v875_v3  ;;  %492 = vmatpush.bf16.msra.mxu1 %v884_v15 }
  0x2a   : > { %835 = vmatmul.msk.bf16.gmra.mxu3 %vm317_vm1, %v880_v11  ;;  %897 = vmatpush.bf16.msra.mxu2 %v884_v15 }
  0x2d   : > { %493 = vmatpush.bf16.msra.mxu1 %v883_v16 }
  0x2e   : > { %898 = vmatpush.bf16.msra.mxu2 %v883_v16  ;;  %v1172_v16 = vld [vmem:[%s1257_s4] ss:$0 sm:$0xff] }
  0x31   : > { %494 = vmatpush.bf16.msra.mxu1 %v882_v17 }
  0x32   : > { %899 = vmatpush.bf16.msra.mxu2 %v882_v17 }
  0x39   : > { %831 = vmatmul.msk.bf16.gmra.mxu0 %vm317_vm1, %v876_v4 }
  0x3a   : > { %836 = vmatmul.msk.bf16.gmra.mxu3 %vm317_vm1, %v881_v13 }
  0x49   : > { %832 = vmatmul.msk.bf16.gmra.mxu0 %vm317_vm1, %v877_v9 }
  0x59   : > { %833 = vmatmul.msk.bf16.gmra.mxu0 %vm317_vm1, %v878_v12 }
  0x96   : > { %v355_v18 = vpop.f32.mrf.mxu0 }
  0x97   : > { %v356_v20 = vadd.f32 %v957_v19, %v355_v18 }
  0x99   : > { %v395_v23 = vmax.f32 %v356_v20, 0.0 }
  0x9d   : > { %v380_v48 = vpop.f32.mrf.mxu3 }
  0x9e   : > { %v357_v21 = vpop.f32.mrf.mxu0  ;;  %v381_v57 = vadd.f32 %v957_v19, %v380_v48 }
  0x9f   : > { %v358_v22 = vadd.f32 %v957_v19, %v357_v21 }
  0xa0   : > { %v405_v59 = vmax.f32 %v381_v57, 0.0 }
  0xa1   : > { %v396_v24 = vmax.f32 %v358_v22, 0.0 }
  0xa3   : > { %v411_v25 = vpack.c.bf16 %v396_v24, %v395_v23 }
  0xa5   : > { %495 = vmatmul.bf16.vlgmr.msra.gmra.mxu1 %v411_v25  ;;  %v382_v52 = vpop.f32.mrf.mxu3 }
  0xa6   : > { %v360_v26 = vpop.f32.mrf.mxu0  ;;  %v383_v58 = vadd.f32 %v957_v19, %v382_v52 }
  0xa7   : > { %v361_v27 = vadd.f32 %v957_v19, %v360_v26 }
  0xa8   : > { %v406_v60 = vmax.f32 %v383_v58, 0.0 }
  0xa9   : > { %v397_v30 = vmax.f32 %v361_v27, 0.0 }
  0xaa   : > { %v416_v61 = vpack.c.bf16 %v406_v60, %v405_v59 }
  0xad   : > { %v385_v56 = vpop.f32.mrf.mxu3 }
  0xae   : > { %v362_v28 = vpop.f32.mrf.mxu0  ;;  %v386_v63 = vadd.f32 %v957_v19, %v385_v56 }
  0xaf   : > { %v363_v29 = vadd.f32 %v957_v19, %v362_v28 }
  0xb0   : > { %v407_v2 = vmax.f32 %v386_v63, 0.0 }
  0xb1   : > { %v398_v31 = vmax.f32 %v363_v29, 0.0 }
  0xb3   : > { %v412_v32 = vpack.c.bf16 %v398_v31, %v397_v30 }
  0xb5   : > { %500 = vmatmul.bf16.gmra.mxu1 %v412_v32  ;;  %v387_v62 = vpop.f32.mrf.mxu3 }
  0xb6   : > { %v365_v33 = vpop.f32.mrf.mxu0  ;;  %v388_v0 = vadd.f32 %v957_v19, %v387_v62 }
  0xb7   : > { %v366_v34 = vadd.f32 %v957_v19, %v365_v33 }
  0xb8   : > { %v408_v3 = vmax.f32 %v388_v0, 0.0 }
  0xb9   : > { %v399_v37 = vmax.f32 %v366_v34, 0.0 }
  0xba   : > { %v417_v4 = vpack.c.bf16 %v408_v3, %v407_v2 }
  0xbd   : > { %v390_v1 = vpop.f32.mrf.mxu3 }
  0xbe   : > { %v367_v35 = vpop.f32.mrf.mxu0  ;;  %v391_v6 = vadd.f32 %v957_v19, %v390_v1 }
  0xbf   : > { %v368_v36 = vadd.f32 %v957_v19, %v367_v35 }
  0xc0   : > { %v409_v8 = vmax.f32 %v391_v6, 0.0 }
  0xc1   : > { %v400_v38 = vmax.f32 %v368_v36, 0.0 }
  0xc3   : > { %v413_v39 = vpack.c.bf16 %v400_v38, %v399_v37 }
  0xc5   : > { %505 = vmatmul.bf16.gmra.mxu1 %v413_v39  ;;  %v392_v5 = vpop.f32.mrf.mxu3 }
  0xc6   : > { %v370_v40 = vpop.f32.mrf.mxu0  ;;  %v393_v7 = vadd.f32 %v957_v19, %v392_v5 }
  0xc7   : > { %v371_v41 = vadd.f32 %v957_v19, %v370_v40 }
  0xc8   : > { %v410_v9 = vmax.f32 %v393_v7, 0.0 }
  0xc9   : > { %v401_v44 = vmax.f32 %v371_v41, 0.0 }
  0xca   : > { %v418_v10 = vpack.c.bf16 %v410_v9, %v409_v8 }
  0xce   : > { %v372_v42 = vpop.f32.mrf.mxu0 }
  0xcf   : > { %v373_v43 = vadd.f32 %v957_v19, %v372_v42 }
  0xd1   : > { %v402_v45 = vmax.f32 %v373_v43, 0.0 }
  0xd3   : > { %v414_v46 = vpack.c.bf16 %v402_v45, %v401_v44 }
  0xd5   : > { %510 = vmatmul.bf16.gmra.mxu1 %v414_v46 }
  0xd6   : > { %v375_v47 = vpop.f32.mrf.mxu0 }
  0xd7   : > { %v376_v49 = vadd.f32 %v957_v19, %v375_v47 }
  0xd9   : > { %v403_v53 = vmax.f32 %v376_v49, 0.0 }
  0xde   : > { %v377_v50 = vpop.f32.mrf.mxu0 }
  0xdf   : > { %v378_v51 = vadd.f32 %v957_v19, %v377_v50 }
  0xe1   : > { %v404_v54 = vmax.f32 %v378_v51, 0.0 }
  0xe3   : > { %v415_v55 = vpack.c.bf16 %v404_v54, %v403_v53 }
  0xe5   : > { %515 = vmatmul.bf16.vlgmr.msra.gmra.mxu2 %v415_v55 }
  0xf5   : > { %520 = vmatmul.bf16.gmra.mxu2 %v416_v61 }
 0x105   : > { %525 = vmatmul.bf16.gmra.mxu2 %v417_v4 }
 0x115   : > { %530 = vmatmul.bf16.gmra.mxu2 %v418_v10 }
 0x122   : > { %v496_v11 = vpop.f32.mrf.mxu1 }
 0x123   : > { %v497_v19 = vadd.f32 %v1172_v16, %v496_v11 }
 0x125   : > { %v536_v25 = vmax.f32 %v497_v19, 0.0 }
 0x127   : > { %v554_v32 = vrot.slane %v536_v25, 4 }
 0x129   : > { %v555_v39 = vmax.f32 %v536_v25, %v554_v32 }
 0x12a   : > { %v498_v12 = vpop.f32.mrf.mxu1 }
 0x12b   : > { %v499_v17 = vadd.f32 %v1172_v16, %v498_v12  ;;  %v556_v47 = vrot.slane %v555_v39, 2 }
 0x12d   : > { %v537_v22 = vmax.f32 %v499_v17, 0.0  ;;  %v557_v56 = vmax.f32 %v555_v39, %v556_v47 }
 0x12f   : > { %v560_v29 = vrot.slane %v537_v22, 4  ;;  %v558_v2 = vrot.slane %v557_v56, 1 }
 0x131   : > { %v561_v35 = vmax.f32 %v537_v22, %v560_v29  ;;  %v559_v11 = vmax.f32 %v557_v56, %v558_v2 }
 0x132   : > { %v501_v13 = vpop.f32.mrf.mxu1 }
 0x133   : > { %v502_v18 = vadd.f32 %v1172_v16, %v501_v13  ;;  %v562_v43 = vrot.slane %v561_v35, 2 }
 0x135   : > { %v538_v23 = vmax.f32 %v502_v18, 0.0  ;;  %v563_v51 = vmax.f32 %v561_v35, %v562_v43 }
 0x137   : > { %v566_v31 = vrot.slane %v538_v23, 4  ;;  %v564_v61 = vrot.slane %v563_v51, 1 }
 0x139   : > { %v567_v37 = vmax.f32 %v538_v23, %v566_v31  ;;  %v565_v6 = vmax.f32 %v563_v51, %v564_v61 }
 0x13a   : > { %v503_v14 = vpop.f32.mrf.mxu1 }
 0x13b   : > { %v504_v20 = vadd.f32 %v1172_v16, %v503_v14  ;;  %v568_v46 = vrot.slane %v567_v37, 2 }
 0x13d   : > { %v539_v26 = vmax.f32 %v504_v20, 0.0  ;;  %v569_v54 = vmax.f32 %v567_v37, %v568_v46 }
 0x13f   : > { %v572_v33 = vrot.slane %v539_v26, 4  ;;  %v570_v0 = vrot.slane %v569_v54, 1 }
 0x141   : > { %v573_v40 = vmax.f32 %v539_v26, %v572_v33  ;;  %v571_v9 = vmax.f32 %v569_v54, %v570_v0 }
 0x142   : > { %v506_v15 = vpop.f32.mrf.mxu1 }
 0x143   : > { %v507_v21 = vadd.f32 %v1172_v16, %v506_v15  ;;  %v574_v48 = vrot.slane %v573_v40, 2  ;;  %v667_v15 = vsel %vm666_vm2, %v565_v6, %v559_v11 }
 0x144   : > { %v669_v19 = vsel %vm668_vm3, %v571_v9, %v667_v15 }
 0x145   : > { %v540_v28 = vmax.f32 %v507_v21, 0.0  ;;  %v575_v57 = vmax.f32 %v573_v40, %v574_v48 }
 0x147   : > { %v578_v34 = vrot.slane %v540_v28, 4  ;;  %v576_v3 = vrot.slane %v575_v57, 1 }
 0x149   : > { %v579_v42 = vmax.f32 %v540_v28, %v578_v34  ;;  %v577_v12 = vmax.f32 %v575_v57, %v576_v3 }
 0x14a   : > { %v508_v24 = vpop.f32.mrf.mxu1 }
 0x14b   : > { %v509_v27 = vadd.f32 %v1172_v16, %v508_v24  ;;  %v580_v50 = vrot.slane %v579_v42, 2  ;;  %v671_v21 = vsel %vm670_vm4, %v577_v12, %v669_v19 }
 0x14d   : > { %v541_v30 = vmax.f32 %v509_v27, 0.0  ;;  %v581_v60 = vmax.f32 %v579_v42, %v580_v50 }
 0x14f   : > { %v584_v36 = vrot.slane %v541_v30, 4  ;;  %v582_v5 = vrot.slane %v581_v60, 1 }
 0x151   : > { %v585_v44 = vmax.f32 %v541_v30, %v584_v36  ;;  %v583_v14 = vmax.f32 %v581_v60, %v582_v5 }
 0x152   : > { %v511_v38 = vpop.f32.mrf.mxu1 }
 0x153   : > { %v512_v41 = vadd.f32 %v1172_v16, %v511_v38  ;;  %v586_v52 = vrot.slane %v585_v44, 2  ;;  %v673_v23 = vsel %vm672_vm5, %v583_v14, %v671_v21 }
 0x155   : > { %v542_v45 = vmax.f32 %v512_v41, 0.0  ;;  %v587_v62 = vmax.f32 %v585_v44, %v586_v52 }
 0x157   : > { %v590_v49 = vrot.slane %v542_v45, 4  ;;  %v588_v7 = vrot.slane %v587_v62, 1 }
 0x159   : > { %v591_v53 = vmax.f32 %v542_v45, %v590_v49  ;;  %v589_v17 = vmax.f32 %v587_v62, %v588_v7 }
 0x15a   : > { %v513_v55 = vpop.f32.mrf.mxu1 }
 0x15b   : > { %v592_v58 = vrot.slane %v591_v53, 2  ;;  %v514_v59 = vadd.f32 %v1172_v16, %v513_v55  ;;  %v675_v25 = vsel %vm674_vm6, %v589_v17, %v673_v23 }
 0x15d   : > { %v543_v63 = vmax.f32 %v514_v59, 0.0  ;;  %v593_v1 = vmax.f32 %v591_v53, %v592_v58 }
 0x15f   : > { %v596_v4 = vrot.slane %v543_v63, 4  ;;  %v594_v10 = vrot.slane %v593_v1, 1 }
 0x161   : > { %v597_v8 = vmax.f32 %v543_v63, %v596_v4  ;;  %v595_v20 = vmax.f32 %v593_v1, %v594_v10 }
 0x163   : > { %v598_v13 = vrot.slane %v597_v8, 2  ;;  %v677_v27 = vsel %vm676_vm7, %v595_v20, %v675_v25 }
 0x165   : > { %v599_v18 = vmax.f32 %v597_v8, %v598_v13 }
 0x167   : > { %v600_v22 = vrot.slane %v599_v18, 1 }
 0x168   : > { %v516_v24 = vpop.f32.mrf.mxu2 }
 0x169   : > { %v601_v26 = vmax.f32 %v599_v18, %v600_v22  ;;  %v517_v36 = vadd.f32 %v1172_v16, %v516_v24 }
 0x16b   : > { %v679_v28 = vsel %vm678_vm8, %v601_v26, %v677_v27  ;;  %v544_v42 = vmax.f32 %v517_v36, 0.0 }
 0x16c   : > { %v689_v29 = vmax.f32 %v679_v28, 0.0 }
 0x16d   : > { %v602_v49 = vrot.slane %v544_v42, 4 }
 0x16e   : > { %698 = vst [vmem:[%s1192_s29] sm:$0xff] %v689_v29 }
 0x16f   : > { %v603_v56 = vmax.f32 %v544_v42, %v602_v49 }
 0x170   : > { %v518_v30 = vpop.f32.mrf.mxu2 }
 0x171   : > { %v519_v34 = vadd.f32 %v1172_v16, %v518_v30  ;;  %v604_v0 = vrot.slane %v603_v56, 2 }
 0x173   : > { %v545_v39 = vmax.f32 %v519_v34, 0.0  ;;  %v605_v9 = vmax.f32 %v603_v56, %v604_v0 }
 0x175   : > { %v608_v46 = vrot.slane %v545_v39, 4  ;;  %v606_v20 = vrot.slane %v605_v9, 1 }
 0x177   : > { %v609_v52 = vmax.f32 %v545_v39, %v608_v46  ;;  %v607_v29 = vmax.f32 %v605_v9, %v606_v20 }
 0x178   : > { %v521_v31 = vpop.f32.mrf.mxu2 }
 0x179   : > { %v522_v35 = vadd.f32 %v1172_v16, %v521_v31  ;;  %v610_v60 = vrot.slane %v609_v52, 2 }
 0x17b   : > { %v546_v40 = vmax.f32 %v522_v35, 0.0  ;;  %v611_v4 = vmax.f32 %v609_v52, %v610_v60 }
 0x17d   : > { %v614_v48 = vrot.slane %v546_v40, 4  ;;  %v612_v14 = vrot.slane %v611_v4, 1 }
 0x17f   : > { %v615_v54 = vmax.f32 %v546_v40, %v614_v48  ;;  %v613_v24 = vmax.f32 %v611_v4, %v612_v14 }
 0x180   : > { %v523_v32 = vpop.f32.mrf.mxu2 }
 0x181   : > { %v524_v37 = vadd.f32 %v1172_v16, %v523_v32  ;;  %v616_v63 = vrot.slane %v615_v54, 2  ;;  %v680_v32 = vsel %vm666_vm2, %v613_v24, %v607_v29 }
 0x183   : > { %v547_v43 = vmax.f32 %v524_v37, 0.0  ;;  %v617_v7 = vmax.f32 %v615_v54, %v616_v63 }
 0x185   : > { %v620_v50 = vrot.slane %v547_v43, 4  ;;  %v618_v18 = vrot.slane %v617_v7, 1 }
 0x187   : > { %v621_v57 = vmax.f32 %v547_v43, %v620_v50  ;;  %v619_v27 = vmax.f32 %v617_v7, %v618_v18 }
 0x188   : > { %v526_v33 = vpop.f32.mrf.mxu2 }
 0x189   : > { %v527_v38 = vadd.f32 %v1172_v16, %v526_v33  ;;  %v622_v1 = vrot.slane %v621_v57, 2  ;;  %v681_v35 = vsel %vm668_vm3, %v619_v27, %v680_v32 }
 0x18b   : > { %v548_v45 = vmax.f32 %v527_v38, 0.0  ;;  %v623_v10 = vmax.f32 %v621_v57, %v622_v1 }
 0x18d   : > { %v626_v51 = vrot.slane %v548_v45, 4  ;;  %v624_v21 = vrot.slane %v623_v10, 1 }
 0x18f   : > { %v627_v59 = vmax.f32 %v548_v45, %v626_v51  ;;  %v625_v30 = vmax.f32 %v623_v10, %v624_v21 }
 0x190   : > { %v528_v41 = vpop.f32.mrf.mxu2 }
 0x191   : > { %v529_v44 = vadd.f32 %v1172_v16, %v528_v41  ;;  %v628_v3 = vrot.slane %v627_v59, 2  ;;  %v682_v37 = vsel %vm670_vm4, %v625_v30, %v681_v35 }
 0x193   : > { %v549_v47 = vmax.f32 %v529_v44, 0.0  ;;  %v629_v13 = vmax.f32 %v627_v59, %v628_v3 }
 0x195   : > { %v632_v53 = vrot.slane %v549_v47, 4  ;;  %v630_v23 = vrot.slane %v629_v13, 1 }
 0x197   : > { %v633_v61 = vmax.f32 %v549_v47, %v632_v53  ;;  %v631_v31 = vmax.f32 %v629_v13, %v630_v23 }
 0x198   : > { %v531_v55 = vpop.f32.mrf.mxu2 }
 0x199   : > { %v532_v58 = vadd.f32 %v1172_v16, %v531_v55  ;;  %v634_v5 = vrot.slane %v633_v61, 2  ;;  %v683_v39 = vsel %vm672_vm5, %v631_v31, %v682_v37 }
 0x19b   : > { %v550_v62 = vmax.f32 %v532_v58, 0.0  ;;  %v635_v15 = vmax.f32 %v633_v61, %v634_v5 }
 0x19d   : > { %v638_v2 = vrot.slane %v550_v62, 4  ;;  %v636_v25 = vrot.slane %v635_v15, 1 }
 0x19f   : > { %v639_v6 = vmax.f32 %v550_v62, %v638_v2  ;;  %v637_v33 = vmax.f32 %v635_v15, %v636_v25 }
 0x1a0   : > { %v533_v8 = vpop.f32.mrf.mxu2 }
 0x1a1   : > { %v640_v11 = vrot.slane %v639_v6, 2  ;;  %v534_v12 = vadd.f32 %v1172_v16, %v533_v8  ;;  %v684_v40 = vsel %vm674_vm6, %v637_v33, %v683_v39 }
 0x1a3   : > { %v551_v17 = vmax.f32 %v534_v12, 0.0  ;;  %v641_v19 = vmax.f32 %v639_v6, %v640_v11 }
 0x1a5   : > { %v644_v22 = vrot.slane %v551_v17, 4  ;;  %v642_v28 = vrot.slane %v641_v19, 1 }
 0x1a7   : > { %v645_v26 = vmax.f32 %v551_v17, %v644_v22  ;;  %v643_v36 = vmax.f32 %v641_v19, %v642_v28 }
 0x1a9   : > { %v646_v16 = vrot.slane %v645_v26, 2  ;;  %v685_v42 = vsel %vm676_vm7, %v643_v36, %v684_v40 }
 0x1ab   : > { %v647_v34 = vmax.f32 %v645_v26, %v646_v16 }
 0x1ad   : > { %v648_v38 = vrot.slane %v647_v34, 1 }
 0x1af   : > { %v649_v41 = vmax.f32 %v647_v34, %v648_v38 }
 0x1b1   : > { %v686_v43 = vsel %vm678_vm8, %v649_v41, %v685_v42 }
 0x1b2   : > { %v690_v44 = vmax.f32 %v686_v43, 0.0 }
 0x1b4   : > { %699 = vst [vmem:[%s1192_s29 + $0x8] sm:$0xff] %v690_v44 }
 0x1b5   : > { %986 = shalt.err (!%p983_p5)
}
 0x1b6   : > { %s1039_s25 = smov 128   ;;  %s1040_s27 = smov 8  }
 0x1b7   : > { %900 = dma.vmem_to_hbm [thread:$0]  (%p1109_p4), %s714_s11, 256, %s716_s12, %s701_s9, %s1039_s25, %s1039_s25, %s1040_s27  }
 0x1b8 PF: > { %p906_p6 = scmp.ge.s32.totalorder %s1037_s23, 2  ;;  %s730_s29 = sand.u32 1, %s1017_s18  }
 0x1b9   : > { %s731_s7 = scalar_lea.sflag [#allocation4], %s730_s29 }
 0x1ba   : > { %p903_p7 = pnand %p906_p6, %p1116_p8 }
 0x1bc   : > { %p904_p9 = pneg %p903_p7 }
 0x1be   : > { %1012 = dma.done.wait (%p904_p9), %s731_s7, 256  }
 0x1bf   : > { %1014 = vsyncadd (%p904_p9), %s731_s7, 4294967040  ;;  %s18_s23 = sadd.s32 1, %s1037_s23   ;;  %s1261_s18 = smov %s1021_s19 }
 0x1c0   : > { %p15_p10 = scmp.ge.s32.totalorder %s18_s23, 4   ;;  %s1262_s19 = smov %s1025_s20 }
 0x1c1   : > { %s1263_s20 = smov %s1122_s6  ;;  %s1264_s21 = smov %s1033_s22 }
 0x1c2   : > { %s1265_s22 = smov %s1267_s26  ;;  %17 = sbr.rel (!%p15_p10) target bundleno = 4 (0x4), region = 83 }
 0x1c7   :  { %737 = vsyncpa [#allocation4], 1 }
 0x1c8   :  { %739 = vsyncpa [#allocation4 + $0x1], 1 }

</bundles_post_ra>
